<compile_context>
chip_gen: v7x
topology: tpu7x:2x2x1
jax: 0.10.0
libtpu: 0.0.40
codegen_flags: <defaults>
</compile_context>

<pallas_src>
import numpy as np
import jax
import jax.numpy as jnp
from jax import lax
from jax.experimental import pallas as pl
from jax.experimental.pallas import tpu as pltpu


LANE = 128                       # TPU lane width; hidden/vocab padded to multiples
_VMEM_LIMIT = 32 * 1024 * 1024   # safe on v5e/v6e (128 MiB phys) and v7x (64 MiB phys)


def _round_up(n, m):
    return ((n + m - 1) // m) * m


# ---------------------------------------------------------------------------
# Kernel 1: fused embedding gather + position encoding (time-major rows)
# ---------------------------------------------------------------------------
def _pe_embed_kernel(ids_ref, tab_ref, l_ref, out_ref):
    # ids_ref: (rows, T) int32   flattened (sentence, batch) rows, token ids
    # tab_ref: (vocabp, Hp) bf16 embedding table, resident across the grid
    # l_ref:   (T, Hp) f32       position-encoding weights (padded cols zero)
    # out_ref: (rows, Hp) bf16   position-encoded sentence embeddings
    rows, T = ids_ref.shape
    vocabp, Hp = tab_ref.shape
    ids = ids_ref[...]
    tab = tab_ref[...]
    lane = lax.broadcasted_iota(jnp.int32, (rows, vocabp), 1)
    acc = jnp.zeros((rows, Hp), jnp.float32)
    # T (tokens per sentence) is small and static: unrolled one-hot MXU gathers,
    # accumulated with plain VPU adds over full (rows, Hp) tiles (no XLU reduce).
    # TODO(synk): for vocabularies too large for a resident VMEM table, switch to
    # a scalar-prefetch DMA row-gather instead of the one-hot matmul.
    for t in range(T):
        onehot = jnp.where(ids[:, t:t + 1] == lane, 1.0, 0.0).astype(jnp.bfloat16)
        emb_t = jnp.dot(onehot, tab, preferred_element_type=jnp.float32)
        acc = acc + emb_t * l_ref[t:t + 1, :]
    out_ref[...] = acc.astype(out_ref.dtype)


def fused_embed_pe_pallas(ids2, table_p, T, hidden):
    """ids2: (N, T) int32 (time-major flattened (S, Bp) rows);
    table_p: (vocabp, Hp) bf16  ->  (N, Hp) bf16 position-encoded embeddings."""
    N, _ = ids2.shape
    vocabp, Hp = table_p.shape

    dt = float(max(T - 1, 1))          # guard T == 1
    de = float(max(hidden - 1, 1))     # guard hidden == 1
    s_i = np.arange(T, dtype=np.float32)[:, None]
    e_i = np.arange(hidden, dtype=np.float32)[None, :]
    l = 1.0 - s_i / dt - e_i / de * (1.0 - 2.0 * s_i / dt)
    l_pad = np.zeros((T, Hp), dtype=np.float32)
    l_pad[:, :hidden] = l
    l_pad = jnp.asarray(l_pad)

    # Large lane-dense row tiles (~1K rows -> ~0.5-1 MiB blocks); pad the row
    # count so every block is full (avoids degenerate tiny tiles for awkward N).
    RT = N if N <= 1024 else 1024
    Np = _round_up(N, RT)
    if Np != N:
        ids2 = jnp.pad(ids2, ((0, Np - N), (0, 0)))

    out = pl.pallas_call(
        _pe_embed_kernel,
        out_shape=jax.ShapeDtypeStruct((Np, Hp), jnp.bfloat16),
        grid=(Np // RT,),
        in_specs=[
            pl.BlockSpec((RT, T), lambda i: (i, 0)),
            pl.BlockSpec((vocabp, Hp), lambda i: (0, 0)),   # table stays resident
            pl.BlockSpec((T, Hp), lambda i: (0, 0)),
        ],
        out_specs=pl.BlockSpec((RT, Hp), lambda i: (i, 0)),
        compiler_params=pltpu.CompilerParams(
            dimension_semantics=("parallel",),
            vmem_limit_bytes=_VMEM_LIMIT),
    )(ids2, table_p, l_pad)
    return out[:N] if Np != N else out


# ---------------------------------------------------------------------------
# Kernel 2: bidirectional GRU (time-major), fwd + bwd halves summed
# ---------------------------------------------------------------------------
def gru_bidir_kernel(x_ref, wih_ref, bih_ref, whh_ref, bhh_ref, out_ref,
                     gx_ref, hcat_ref, bwd_ref):
    # x_ref:    (S, TB, Hp) bf16 time-major input block
    # wih_ref:  (Hp, 6Hp) bf16  [fwd r|z|n | bwd r|z|n], lane-aligned gate tiles
    # bih_ref:  (1, 6Hp) f32
    # whh_ref:  (2Hp, 6Hp) bf16 block-diagonal [fwd | bwd] recurrent weights
    # bhh_ref:  (1, 6Hp) f32
    # out_ref:  (S, TB, Hp) f32  (fwd + bwd hidden states)
    S, TB, Hp = x_ref.shape

    # ---- hoisted input projection: ONE big MXU matmul for both directions ----
    x2 = x_ref[...].reshape(S * TB, Hp)                              # bf16
    gx = jnp.dot(x2, wih_ref[...], preferred_element_type=jnp.float32)
    gx = gx + bih_ref[...]
    gx_ref[...] = gx.reshape(S, TB, 6 * Hp).astype(gx_ref.dtype)     # bf16 scratch

    hcat_ref[...] = jnp.zeros((TB, 2 * Hp), jnp.float32)             # h_f || h_b
    bhh = bhh_ref[...]

    def step(i, carry):
        t_b = S - 1 - i
        hcat = hcat_ref[...]
        # fwd + bwd recurrent matmuls fused into one K=2*Hp MXU push per step
        gh = jnp.dot(hcat.astype(jnp.bfloat16), whh_ref[...],
                     preferred_element_type=jnp.float32) + bhh       # (TB, 6Hp)
        gx_f = gx_ref[i]       # (TB, 6Hp) bf16; fwd uses cols [0, 3Hp)
        gx_b = gx_ref[t_b]     #                 bwd uses cols [3Hp, 6Hp)
        h_f = hcat[:, 0:Hp]
        h_b = hcat[:, Hp:2 * Hp]
        # forward direction, t = i (lane-aligned gate tiles)
        r_f = jax.nn.sigmoid(gx_f[:, 0:Hp] + gh[:, 0:Hp])
        z_f = jax.nn.sigmoid(gx_f[:, Hp:2 * Hp] + gh[:, Hp:2 * Hp])
        n_f = jnp.tanh(gx_f[:, 2 * Hp:3 * Hp] + r_f * gh[:, 2 * Hp:3 * Hp])
        hf_new = (1.0 - z_f) * n_f + z_f * h_f
        # backward direction, t = S-1-i
        r_b = jax.nn.sigmoid(gx_b[:, 3 * Hp:4 * Hp] + gh[:, 3 * Hp:4 * Hp])
        z_b = jax.nn.sigmoid(gx_b[:, 4 * Hp:5 * Hp] + gh[:, 4 * Hp:5 * Hp])
        n_b = jnp.tanh(gx_b[:, 5 * Hp:6 * Hp] + r_b * gh[:, 5 * Hp:6 * Hp])
        hb_new = (1.0 - z_b) * n_b + z_b * h_b
        # commit state + per-step outputs (full (TB, Hp) tile stores)
        hcat_ref[:, 0:Hp] = hf_new
        hcat_ref[:, Hp:2 * Hp] = hb_new
        out_ref[i] = hf_new
        bwd_ref[t_b] = hb_new
        return carry

    # fori_loop keeps LLO scheduling visibility and bounds per-step live ranges
    lax.fori_loop(0, S, step, None, unroll=(True if S <= 16 else 4))

    # single vectorized fwd + bwd combine (no per-step RMW of the output tile)
    out_ref[...] = out_ref[...] + bwd_ref[...]


def _gru_batch_tile(Bp, S):
    """Bp is a multiple of 8. Pick a multiple-of-8 divisor of Bp: large enough to
    feed the MXU (up to 64 rows), small enough for the VMEM budget, and giving a
    grid of >=2 blocks when possible so both v7x TensorCores get work."""
    vmem_cap = max(8, ((3072 // max(S, 1)) // 8) * 8)   # ~3.6 KB VMEM per (step,row)
    cap = min(64, vmem_cap)
    if Bp >= 16:
        cap = min(cap, max(8, Bp // 2))                  # ensure grid >= 2
    tb = max(8, (min(Bp, cap) // 8) * 8)
    while Bp % tb:
        tb -= 8
    return max(tb, 8)


def gru_bidir_pallas(x_tm, p):
    """x_tm: (S, Bp, Hp) bf16 time-major -> (S, Bp, Hp) f32 (fwd + bwd summed)."""
    # TODO(synk): very long sequences should additionally chunk S (current block
    # keeps the whole sequence per batch tile in VMEM).
    S, Bp, Hp = x_tm.shape
    tb = _gru_batch_tile(Bp, S)
    grid = (Bp // tb,)

    in_specs = [
        pl.BlockSpec((S, tb, Hp), lambda b: (0, b, 0)),
        pl.BlockSpec(p["wih"].shape, lambda b: (0, 0)),
        pl.BlockSpec(p["bih"].shape, lambda b: (0, 0)),
        pl.BlockSpec(p["whh"].shape, lambda b: (0, 0)),
        pl.BlockSpec(p["bhh"].shape, lambda b: (0, 0)),
    ]
    out_specs = pl.BlockSpec((S, tb, Hp), lambda b: (0, b, 0))
    scratch = [
        pltpu.VMEM((S, tb, 6 * Hp), jnp.bfloat16),  # precomputed input gates (both dirs)
        pltpu.VMEM((tb, 2 * Hp), jnp.float32),      # h_fwd || h_bwd
        pltpu.VMEM((S, tb, Hp), jnp.float32),       # bwd outputs (combined at the end)
    ]
    return pl.pallas_call(
        gru_bidir_kernel,
        out_shape=jax.ShapeDtypeStruct((S, Bp, Hp), jnp.float32),
        grid=grid,
        in_specs=in_specs,
        out_specs=out_specs,
        scratch_shapes=scratch,
        compiler_params=pltpu.CompilerParams(
            dimension_semantics=("parallel",),
            vmem_limit_bytes=_VMEM_LIMIT),
    )(x_tm, p["wih"], p["bih"], p["whh"], p["bhh"])


# ---------------------------------------------------------------------------
# Parameter init (deterministic), lane-padded packing, full forward
# ---------------------------------------------------------------------------
def init_params(key, vocab_size, hidden_size):
    H = hidden_size
    Hp = max(LANE, _round_up(H, LANE))
    ks = jax.random.split(key, 10)

    def xavier(k, shape):
        fan_out, fan_in = shape
        std = np.sqrt(2.0 / (fan_in + fan_out))
        return std * jax.random.normal(k, shape, dtype=jnp.float32)

    def bias(k, n):
        bound = 1.0 / np.sqrt(H)
        return jax.random.uniform(k, (1, n), minval=-bound, maxval=bound,
                                  dtype=jnp.float32)

    emb_table = 0.1 * jax.random.normal(ks[0], (vocab_size, H), dtype=jnp.float32)

    raw = {
        # stored pre-transposed: (H, 3H) so kernels compute x @ W; gate order (r,z,n)
        "wih_f": xavier(ks[1], (3 * H, H)).T,
        "whh_f": xavier(ks[2], (3 * H, H)).T,
        "bih_f": bias(ks[3], 3 * H),
        "bhh_f": bias(ks[4], 3 * H),
        "wih_b": xavier(ks[5], (3 * H, H)).T,
        "whh_b": xavier(ks[6], (3 * H, H)).T,
        "bih_b": bias(ks[7], 3 * H),
        "bhh_b": bias(ks[8], 3 * H),
    }
    return emb_table, raw, Hp


def _pad_gates_w(w, H, Hp):
    """(H, 3H) -> (Hp, 3Hp); each gate block starts at a 128-lane boundary."""
    out = np.zeros((Hp, 3 * Hp), np.float32)
    w = np.asarray(w)
    for g in range(3):
        out[:H, g * Hp:g * Hp + H] = w[:, g * H:(g + 1) * H]
    return out


def _pad_gates_b(b, H, Hp):
    out = np.zeros((1, 3 * Hp), np.float32)
    b = np.asarray(b)
    for g in range(3):
        out[:, g * Hp:g * Hp + H] = b[:, g * H:(g + 1) * H]
    return out


def pack_params(raw, H, Hp):
    wih = np.concatenate([_pad_gates_w(raw["wih_f"], H, Hp),
                          _pad_gates_w(raw["wih_b"], H, Hp)], axis=1)   # (Hp, 6Hp)
    bih = np.concatenate([_pad_gates_b(raw["bih_f"], H, Hp),
                          _pad_gates_b(raw["bih_b"], H, Hp)], axis=1)   # (1, 6Hp)
    # block-diagonal recurrent weights: one K=2*Hp matmul drives both directions
    whh = np.zeros((2 * Hp, 6 * Hp), np.float32)
    whh[:Hp, :3 * Hp] = _pad_gates_w(raw["whh_f"], H, Hp)
    whh[Hp:, 3 * Hp:] = _pad_gates_w(raw["whh_b"], H, Hp)
    bhh = np.concatenate([_pad_gates_b(raw["bhh_f"], H, Hp),
                          _pad_gates_b(raw["bhh_b"], H, Hp)], axis=1)
    return {
        "wih": jnp.asarray(wih, dtype=jnp.bfloat16),   # MXU operands in bf16
        "bih": jnp.asarray(bih, dtype=jnp.float32),    # biases stay f32
        "whh": jnp.asarray(whh, dtype=jnp.bfloat16),
        "bhh": jnp.asarray(bhh, dtype=jnp.float32),
    }


def input_module_forward(contexts, emb_table_p, gru_params, hidden):
    """contexts: (B, S, T) int32 -> facts: (B, S, hidden) f32."""
    B, S, T = contexts.shape
    vocabp, Hp = emb_table_p.shape

    # pad batch to a multiple of 8 so every (tb, Hp) tile is a full (8,128) tile
    Bp = max(8, _round_up(B, 8))
    if Bp != B:
        contexts = jnp.pad(contexts, ((0, Bp - B), (0, 0), (0, 0)))

    # only the tiny id tensor is transposed/moved; the (S,B,T,Hp) embedded tensor
    # is never materialized in HBM (gather is fused into the PE kernel).
    ids2 = jnp.transpose(contexts, (1, 0, 2)).reshape(S * Bp, T)
    pe2 = fused_embed_pe_pallas(ids2, emb_table_p, T, hidden)   # (S*Bp, Hp) bf16
    pe_tm = pe2.reshape(S, Bp, Hp)                              # time-major

    # TODO(synk): nn.Dropout(0.1) train-mode mask needs RNG; identity = eval semantics.
    out_tm = gru_bidir_pallas(pe_tm, gru_params)                # (S, Bp, Hp) f32
    facts = jnp.transpose(out_tm, (1, 0, 2))[:B, :, :hidden]    # batch-first, un-pad
    return facts


# ---------------------------------------------------------------------------
# Pure-JAX reference (same bf16-operand / f32-accumulate matmul convention)
# ---------------------------------------------------------------------------
def reference_forward(contexts, emb_table, raw, H):
    B, S, T = contexts.shape
    flat = contexts.reshape(B, S * T)
    embedded = jnp.take(emb_table, flat, axis=0).reshape(B, S, T, H)

    dt = float(max(T - 1, 1))
    de = float(max(H - 1, 1))
    s = np.arange(T, dtype=np.float32)[:, None]
    e = np.arange(H, dtype=np.float32)[None, :]
    l = 1.0 - s / dt - e / de * (1.0 - 2.0 * s / dt)
    pe = jnp.sum(embedded * jnp.asarray(l)[None, None], axis=2)

    def mm(a, b):
        return jnp.dot(a.astype(jnp.bfloat16), b.astype(jnp.bfloat16),
                       preferred_element_type=jnp.float32)

    def cell(xt, h, wih, whh, bih, bhh):
        gx = mm(xt, wih) + bih
        gh = mm(h, whh) + bhh
        r = jax.nn.sigmoid(gx[:, :H] + gh[:, :H])
        z = jax.nn.sigmoid(gx[:, H:2 * H] + gh[:, H:2 * H])
        n = jnp.tanh(gx[:, 2 * H:] + r * gh[:, 2 * H:])
        return (1 - z) * n + z * h

    out = jnp.zeros((B, S, H), jnp.float32)
    h = jnp.zeros((B, H), jnp.float32)
    for t in range(S):
        h = cell(pe[:, t], h, raw["wih_f"], raw["whh_f"], raw["bih_f"], raw["bhh_f"])
        out = out.at[:, t].add(h)
    h = jnp.zeros((B, H), jnp.float32)
    for t in range(S - 1, -1, -1):
        h = cell(pe[:, t], h, raw["wih_b"], raw["whh_b"], raw["bih_b"], raw["bhh_b"])
        out = out.at[:, t].add(h)
    return out


if __name__ == "__main__":
    batch, sen, token, hidden, vocab = 2, 4, 8, 32, 50

    key = jax.random.PRNGKey(0)
    k_ids, k_par = jax.random.split(key)
    contexts = jax.random.randint(k_ids, (batch, sen, token), 0, vocab,
                                  dtype=jnp.int32)

    emb_table, raw, Hp = init_params(k_par, vocab, hidden)
    # lane-padded bf16 embedding table (zero rows/cols in the padded region)
    vocabp = max(LANE, _round_up(vocab, LANE))
    emb_table_p = (jnp.zeros((vocabp, Hp), jnp.float32)
                   .at[:vocab, :hidden].set(emb_table)).astype(jnp.bfloat16)
    gru_params = pack_params(raw, hidden, Hp)

    facts = input_module_forward(contexts, emb_table_p, gru_params, hidden)
    facts = jax.block_until_ready(facts)
    assert facts.shape == (batch, sen, hidden)

    ref = jax.block_until_ready(reference_forward(contexts, emb_table, raw, hidden))
    np.testing.assert_allclose(np.asarray(facts), np.asarray(ref),
                               rtol=2e-2, atol=2e-2)
    print("KERNEL_OK")
</pallas_src>

<mosaic_0001>
module attributes {stable_mosaic.version = 11 : i64} {
  func.func @_pe_embed_kernel(%arg0: i32, %arg1: memref<32x8xi32, #tpu.memory_space<vmem>>, %arg2: memref<128x128xbf16, #tpu.memory_space<vmem>>, %arg3: memref<8x128xf32, #tpu.memory_space<vmem>>, %arg4: memref<32x128xbf16, #tpu.memory_space<vmem>>) attributes {dimension_semantics = [#tpu.dimension_semantics<parallel>], iteration_bounds = array<i64: 1>, scalar_prefetch = 0 : i64, scratch_operands = 0 : i64, tpu.core_type = #tpu.core_type<tc>, window_params = [{transform_indices = @transform_0, window_bounds = array<i64: 32, 8>}, {pipeline_mode = #tpu.pipeline_mode<synchronous>, transform_indices = @transform_1, window_bounds = array<i64: 128, 128>}, {pipeline_mode = #tpu.pipeline_mode<synchronous>, transform_indices = @transform_2, window_bounds = array<i64: 8, 128>}, {transform_indices = @transform_3, window_bounds = array<i64: 32, 128>}]} {
    %c0 = arith.constant 0 : index
    %c0_0 = arith.constant 0 : index
    %0 = vector.load %arg1[%c0, %c0_0] : memref<32x8xi32, #tpu.memory_space<vmem>>, vector<32x8xi32>
    %c0_1 = arith.constant 0 : index
    %c0_2 = arith.constant 0 : index
    %1 = vector.load %arg2[%c0_1, %c0_2] : memref<128x128xbf16, #tpu.memory_space<vmem>>, vector<128x128xbf16>
    %2 = tpu.iota {dimensions = array<i32: 1>} : vector<32x128xi32>
    %cst = arith.constant 0.000000e+00 : f32
    %3 = vector.broadcast %cst : f32 to vector<32x128xf32>
    %4 = vector.extract_strided_slice %0 {offsets = [0, 0], sizes = [32, 1], strides = [1, 1]} : vector<32x8xi32> to vector<32x1xi32>
    %5 = vector.broadcast %4 : vector<32x1xi32> to vector<32x128xi32>
    %6 = arith.cmpi eq, %5, %2 : vector<32x128xi32>
    %cst_3 = arith.constant 1.000000e+00 : f32
    %cst_4 = arith.constant 0.000000e+00 : f32
    %7 = vector.broadcast %cst_3 : f32 to vector<32x128xf32>
    %8 = vector.broadcast %cst_4 : f32 to vector<32x128xf32>
    %9 = arith.select %6, %7, %8 : vector<32x128xi1>, vector<32x128xf32>
    %10 = arith.truncf %9 : vector<32x128xf32> to vector<32x128xbf16>
    %cst_5 = arith.constant dense<0.000000e+00> : vector<32x128xf32>
    %11 = tpu.matmul %10, %1, %cst_5 {dimension_numbers = #tpu.dot_dimension_numbers<[1], [0], [0], [1], [0, 0, 1, 1], [], []>} : vector<32x128xbf16>, vector<128x128xbf16>, vector<32x128xf32> -> vector<32x128xf32>
    %c0_6 = arith.constant 0 : index
    %c0_7 = arith.constant 0 : index
    %12 = vector.load %arg3[%c0_6, %c0_7] : memref<8x128xf32, #tpu.memory_space<vmem>>, vector<1x128xf32>
    %13 = vector.broadcast %12 : vector<1x128xf32> to vector<32x128xf32>
    %14 = arith.mulf %11, %13 : vector<32x128xf32>
    %15 = arith.addf %3, %14 : vector<32x128xf32>
    %16 = vector.extract_strided_slice %0 {offsets = [0, 1], sizes = [32, 1], strides = [1, 1]} : vector<32x8xi32> to vector<32x1xi32>
    %17 = vector.broadcast %16 : vector<32x1xi32> to vector<32x128xi32>
    %18 = arith.cmpi eq, %17, %2 : vector<32x128xi32>
    %cst_8 = arith.constant 1.000000e+00 : f32
    %cst_9 = arith.constant 0.000000e+00 : f32
    %19 = vector.broadcast %cst_8 : f32 to vector<32x128xf32>
    %20 = vector.broadcast %cst_9 : f32 to vector<32x128xf32>
    %21 = arith.select %18, %19, %20 : vector<32x128xi1>, vector<32x128xf32>
    %22 = arith.truncf %21 : vector<32x128xf32> to vector<32x128xbf16>
    %cst_10 = arith.constant dense<0.000000e+00> : vector<32x128xf32>
    %23 = tpu.matmul %22, %1, %cst_10 {dimension_numbers = #tpu.dot_dimension_numbers<[1], [0], [0], [1], [0, 0, 1, 1], [], []>} : vector<32x128xbf16>, vector<128x128xbf16>, vector<32x128xf32> -> vector<32x128xf32>
    %c1 = arith.constant 1 : index
    %c0_11 = arith.constant 0 : index
    %24 = vector.load %arg3[%c1, %c0_11] : memref<8x128xf32, #tpu.memory_space<vmem>>, vector<1x128xf32>
    %25 = vector.broadcast %24 : vector<1x128xf32> to vector<32x128xf32>
    %26 = arith.mulf %23, %25 : vector<32x128xf32>
    %27 = arith.addf %15, %26 : vector<32x128xf32>
    %28 = vector.extract_strided_slice %0 {offsets = [0, 2], sizes = [32, 1], strides = [1, 1]} : vector<32x8xi32> to vector<32x1xi32>
    %29 = vector.broadcast %28 : vector<32x1xi32> to vector<32x128xi32>
    %30 = arith.cmpi eq, %29, %2 : vector<32x128xi32>
    %cst_12 = arith.constant 1.000000e+00 : f32
    %cst_13 = arith.constant 0.000000e+00 : f32
    %31 = vector.broadcast %cst_12 : f32 to vector<32x128xf32>
    %32 = vector.broadcast %cst_13 : f32 to vector<32x128xf32>
    %33 = arith.select %30, %31, %32 : vector<32x128xi1>, vector<32x128xf32>
    %34 = arith.truncf %33 : vector<32x128xf32> to vector<32x128xbf16>
    %cst_14 = arith.constant dense<0.000000e+00> : vector<32x128xf32>
    %35 = tpu.matmul %34, %1, %cst_14 {dimension_numbers = #tpu.dot_dimension_numbers<[1], [0], [0], [1], [0, 0, 1, 1], [], []>} : vector<32x128xbf16>, vector<128x128xbf16>, vector<32x128xf32> -> vector<32x128xf32>
    %c2 = arith.constant 2 : index
    %c0_15 = arith.constant 0 : index
    %36 = vector.load %arg3[%c2, %c0_15] : memref<8x128xf32, #tpu.memory_space<vmem>>, vector<1x128xf32>
    %37 = vector.broadcast %36 : vector<1x128xf32> to vector<32x128xf32>
    %38 = arith.mulf %35, %37 : vector<32x128xf32>
    %39 = arith.addf %27, %38 : vector<32x128xf32>
    %40 = vector.extract_strided_slice %0 {offsets = [0, 3], sizes = [32, 1], strides = [1, 1]} : vector<32x8xi32> to vector<32x1xi32>
    %41 = vector.broadcast %40 : vector<32x1xi32> to vector<32x128xi32>
    %42 = arith.cmpi eq, %41, %2 : vector<32x128xi32>
    %cst_16 = arith.constant 1.000000e+00 : f32
    %cst_17 = arith.constant 0.000000e+00 : f32
    %43 = vector.broadcast %cst_16 : f32 to vector<32x128xf32>
    %44 = vector.broadcast %cst_17 : f32 to vector<32x128xf32>
    %45 = arith.select %42, %43, %44 : vector<32x128xi1>, vector<32x128xf32>
    %46 = arith.truncf %45 : vector<32x128xf32> to vector<32x128xbf16>
    %cst_18 = arith.constant dense<0.000000e+00> : vector<32x128xf32>
    %47 = tpu.matmul %46, %1, %cst_18 {dimension_numbers = #tpu.dot_dimension_numbers<[1], [0], [0], [1], [0, 0, 1, 1], [], []>} : vector<32x128xbf16>, vector<128x128xbf16>, vector<32x128xf32> -> vector<32x128xf32>
    %c3 = arith.constant 3 : index
    %c0_19 = arith.constant 0 : index
    %48 = vector.load %arg3[%c3, %c0_19] : memref<8x128xf32, #tpu.memory_space<vmem>>, vector<1x128xf32>
    %49 = vector.broadcast %48 : vector<1x128xf32> to vector<32x128xf32>
    %50 = arith.mulf %47, %49 : vector<32x128xf32>
    %51 = arith.addf %39, %50 : vector<32x128xf32>
    %52 = vector.extract_strided_slice %0 {offsets = [0, 4], sizes = [32, 1], strides = [1, 1]} : vector<32x8xi32> to vector<32x1xi32>
    %53 = vector.broadcast %52 : vector<32x1xi32> to vector<32x128xi32>
    %54 = arith.cmpi eq, %53, %2 : vector<32x128xi32>
    %cst_20 = arith.constant 1.000000e+00 : f32
    %cst_21 = arith.constant 0.000000e+00 : f32
    %55 = vector.broadcast %cst_20 : f32 to vector<32x128xf32>
    %56 = vector.broadcast %cst_21 : f32 to vector<32x128xf32>
    %57 = arith.select %54, %55, %56 : vector<32x128xi1>, vector<32x128xf32>
    %58 = arith.truncf %57 : vector<32x128xf32> to vector<32x128xbf16>
    %cst_22 = arith.constant dense<0.000000e+00> : vector<32x128xf32>
    %59 = tpu.matmul %58, %1, %cst_22 {dimension_numbers = #tpu.dot_dimension_numbers<[1], [0], [0], [1], [0, 0, 1, 1], [], []>} : vector<32x128xbf16>, vector<128x128xbf16>, vector<32x128xf32> -> vector<32x128xf32>
    %c4 = arith.constant 4 : index
    %c0_23 = arith.constant 0 : index
    %60 = vector.load %arg3[%c4, %c0_23] : memref<8x128xf32, #tpu.memory_space<vmem>>, vector<1x128xf32>
    %61 = vector.broadcast %60 : vector<1x128xf32> to vector<32x128xf32>
    %62 = arith.mulf %59, %61 : vector<32x128xf32>
    %63 = arith.addf %51, %62 : vector<32x128xf32>
    %64 = vector.extract_strided_slice %0 {offsets = [0, 5], sizes = [32, 1], strides = [1, 1]} : vector<32x8xi32> to vector<32x1xi32>
    %65 = vector.broadcast %64 : vector<32x1xi32> to vector<32x128xi32>
    %66 = arith.cmpi eq, %65, %2 : vector<32x128xi32>
    %cst_24 = arith.constant 1.000000e+00 : f32
    %cst_25 = arith.constant 0.000000e+00 : f32
    %67 = vector.broadcast %cst_24 : f32 to vector<32x128xf32>
    %68 = vector.broadcast %cst_25 : f32 to vector<32x128xf32>
    %69 = arith.select %66, %67, %68 : vector<32x128xi1>, vector<32x128xf32>
    %70 = arith.truncf %69 : vector<32x128xf32> to vector<32x128xbf16>
    %cst_26 = arith.constant dense<0.000000e+00> : vector<32x128xf32>
    %71 = tpu.matmul %70, %1, %cst_26 {dimension_numbers = #tpu.dot_dimension_numbers<[1], [0], [0], [1], [0, 0, 1, 1], [], []>} : vector<32x128xbf16>, vector<128x128xbf16>, vector<32x128xf32> -> vector<32x128xf32>
    %c5 = arith.constant 5 : index
    %c0_27 = arith.constant 0 : index
    %72 = vector.load %arg3[%c5, %c0_27] : memref<8x128xf32, #tpu.memory_space<vmem>>, vector<1x128xf32>
    %73 = vector.broadcast %72 : vector<1x128xf32> to vector<32x128xf32>
    %74 = arith.mulf %71, %73 : vector<32x128xf32>
    %75 = arith.addf %63, %74 : vector<32x128xf32>
    %76 = vector.extract_strided_slice %0 {offsets = [0, 6], sizes = [32, 1], strides = [1, 1]} : vector<32x8xi32> to vector<32x1xi32>
    %77 = vector.broadcast %76 : vector<32x1xi32> to vector<32x128xi32>
    %78 = arith.cmpi eq, %77, %2 : vector<32x128xi32>
    %cst_28 = arith.constant 1.000000e+00 : f32
    %cst_29 = arith.constant 0.000000e+00 : f32
    %79 = vector.broadcast %cst_28 : f32 to vector<32x128xf32>
    %80 = vector.broadcast %cst_29 : f32 to vector<32x128xf32>
    %81 = arith.select %78, %79, %80 : vector<32x128xi1>, vector<32x128xf32>
    %82 = arith.truncf %81 : vector<32x128xf32> to vector<32x128xbf16>
    %cst_30 = arith.constant dense<0.000000e+00> : vector<32x128xf32>
    %83 = tpu.matmul %82, %1, %cst_30 {dimension_numbers = #tpu.dot_dimension_numbers<[1], [0], [0], [1], [0, 0, 1, 1], [], []>} : vector<32x128xbf16>, vector<128x128xbf16>, vector<32x128xf32> -> vector<32x128xf32>
    %c6 = arith.constant 6 : index
    %c0_31 = arith.constant 0 : index
    %84 = vector.load %arg3[%c6, %c0_31] : memref<8x128xf32, #tpu.memory_space<vmem>>, vector<1x128xf32>
    %85 = vector.broadcast %84 : vector<1x128xf32> to vector<32x128xf32>
    %86 = arith.mulf %83, %85 : vector<32x128xf32>
    %87 = arith.addf %75, %86 : vector<32x128xf32>
    %88 = vector.extract_strided_slice %0 {offsets = [0, 7], sizes = [32, 1], strides = [1, 1]} : vector<32x8xi32> to vector<32x1xi32>
    %89 = vector.broadcast %88 : vector<32x1xi32> to vector<32x128xi32>
    %90 = arith.cmpi eq, %89, %2 : vector<32x128xi32>
    %cst_32 = arith.constant 1.000000e+00 : f32
    %cst_33 = arith.constant 0.000000e+00 : f32
    %91 = vector.broadcast %cst_32 : f32 to vector<32x128xf32>
    %92 = vector.broadcast %cst_33 : f32 to vector<32x128xf32>
    %93 = arith.select %90, %91, %92 : vector<32x128xi1>, vector<32x128xf32>
    %94 = arith.truncf %93 : vector<32x128xf32> to vector<32x128xbf16>
    %cst_34 = arith.constant dense<0.000000e+00> : vector<32x128xf32>
    %95 = tpu.matmul %94, %1, %cst_34 {dimension_numbers = #tpu.dot_dimension_numbers<[1], [0], [0], [1], [0, 0, 1, 1], [], []>} : vector<32x128xbf16>, vector<128x128xbf16>, vector<32x128xf32> -> vector<32x128xf32>
    %c7 = arith.constant 7 : index
    %c0_35 = arith.constant 0 : index
    %96 = vector.load %arg3[%c7, %c0_35] : memref<8x128xf32, #tpu.memory_space<vmem>>, vector<1x128xf32>
    %97 = vector.broadcast %96 : vector<1x128xf32> to vector<32x128xf32>
    %98 = arith.mulf %95, %97 : vector<32x128xf32>
    %99 = arith.addf %87, %98 : vector<32x128xf32>
    %100 = arith.truncf %99 : vector<32x128xf32> to vector<32x128xbf16>
    %c0_36 = arith.constant 0 : index
    %c0_37 = arith.constant 0 : index
    %101 = vector.load %arg4[%c0_36, %c0_37] : memref<32x128xbf16, #tpu.memory_space<vmem>>, vector<32x128xbf16>
    tpu.vector_store %arg4[%c0_36, %c0_37], %100 {strides = array<i32>} : memref<32x128xbf16, #tpu.memory_space<vmem>>, vector<32x128xbf16>,
    return
  }
  func.func @transform_0(%arg0: i32) -> (i32, i32) {
    %c0_i32 = arith.constant 0 : i32
    %c0_i32_0 = arith.constant 0 : i32
    return %arg0, %c0_i32 : i32, i32
  }
  func.func @transform_1(%arg0: i32) -> (i32, i32) {
    %c0_i32 = arith.constant 0 : i32
    %c0_i32_0 = arith.constant 0 : i32
    %c0_i32_1 = arith.constant 0 : i32
    return %c0_i32, %c0_i32_0 : i32, i32
  }
  func.func @transform_2(%arg0: i32) -> (i32, i32) {
    %c0_i32 = arith.constant 0 : i32
    %c0_i32_0 = arith.constant 0 : i32
    %c0_i32_1 = arith.constant 0 : i32
    return %c0_i32, %c0_i32_0 : i32, i32
  }
  func.func @transform_3(%arg0: i32) -> (i32, i32) {
    %c0_i32 = arith.constant 0 : i32
    %c0_i32_0 = arith.constant 0 : i32
    return %arg0, %c0_i32 : i32, i32
  }
}

</mosaic_0001>

<bundles_post_ra>
// kernel: tpu_custom_call.1
= control target key start
LH: loop header
LB: loop body
LE: loop exit
PB: predicated region body
PF: predicated region fallthrough
CT: control target
= control target key end

     0   :  { %8 = vsyncpa [#allocation3], 0  ;;  %s1534_s0 = inlined_call_operand.vmem [shape: s32[32,8], index: 0, kind: input, shape index: {}]   ;;  %s1535_s1 = inlined_call_operand.hbm [shape: bf16[128,128], index: 1, kind: input, shape index: {}]   ;;  %s1536_s2 = inlined_call_operand.vmem [shape: f32[8,128], index: 2, kind: input, shape index: {}]   ;;  %s1537_s3 = inlined_call_operand.hbm [shape: bf16[32,128], index: 3, kind: output, shape index: {}]  }
   0x1   :  { %9 = vsyncpa [#allocation4], 0  ;;  %s1201_s12 = smov [#allocation2]   ;;  %s1153_s16 = scalar_lea.hbm %s1535_s1, 1024 }
   0x2   :  { %s17_s13 = sshll.u32 %s1201_s12, 4  ;;  %p1154_p0 = scmp.ne.s32.totalorder %s1535_s1, %s1153_s16  ;;  %s18_s13 = int_to_ptr.vmem [resolvable:$true] %s17_s13 }
   0x3   :  { %p1157_p1 = scmp.lt.u32.totalorder %s1153_s16, %s1535_s1 }
   0x5   :  { %p1159_p2 = pnand %p1157_p1, %p1154_p0 }
   0x7   :  { %1162 = shalt.err (!%p1159_p2)
}
   0x8   :  { %s1163_s21 = scalar_lea.vmem %s18_s13, 1024  ;;  %p1168_p4 = scmp.lt.s32.totalorder %s18_s13, %s18_s13 }
   0x9   :  { %p1164_p3 = scmp.ne.s32.totalorder %s18_s13, %s1163_s21  ;;  %p1169_p5 = scmp.lt.s32.totalorder %s1163_s21, %s1163_s21 }
   0xb   :  { %p1170_p6 = por %p1169_p5, %p1168_p4 }
   0xd   :  { %p1171_p7 = pnand %p1170_p6, %p1164_p3 }
   0xf   :  { %1174 = shalt.err (!%p1171_p7)
}
  0x10   :  { %s1202_s22 = smov 64   ;;  %s1203_s23 = smov 4  }
  0x11   :  { %23 = dma.hbm_to_vmem [thread:$0]  %s1535_s1, 1024, %s18_s13, [#allocation3], %s1202_s22, %s1202_s22, %s1203_s23  }
  0x12   :  { %1197 = dma.done.wait [#allocation3], 1024  }
  0x13   :  { %1198 = vsyncadd [#allocation3], 4294966272  ;;  %v1204_v0 = vmov 0   ;;  %v1252_v1 = vld [vmem:[%s1534_s0 + $0x10] sm:$0xff]  ;;  %v1257_v2 = vld [vmem:[%s1534_s0] sm:$0xff]  ;;  %v1205_v8 = vmov 1   ;;  %v50_v20 = vlaneseq }
  0x14   :  { %1130 = vset.pattern.permute.xlu1 %v1204_v0  ;;  %1129 = vset.pattern.permute.xlu0 %v1204_v0  ;;  %v1262_v3 = vld [vmem:[%s1534_s0 + $0x18] sm:$0xff]  ;;  %v1269_v4 = vld [vmem:[%s1534_s0 + $0x8] sm:$0xff]  ;;  %v1271_v5 = vld [vmem:[#allocation2] sm:$0xff]   ;;  %v1206_v11 = vmov 2   ;;  %v1207_v13 = vmov 3   ;;  %v1208_v16 = vmov 4  }
  0x15   :  { %59 = vperm.xlu1 %1130, %v1252_v1   ;;  %53 = vperm.xlu0 %1129, %v1257_v2   ;;  %v1273_v6 = vld [vmem:[#allocation2 + $0x8] sm:$0xff]   ;;  %v1283_v7 = vld [vmem:[#allocation2 + $0x10] sm:$0xff]   ;;  %v1290_v9 = vld [vmem:[#allocation2 + $0x18] sm:$0xff]   ;;  %v1209_v17 = vmov 5   ;;  %v1210_v18 = vmov 6   ;;  %v1211_v19 = vmov 7  }
  0x16   :  { %956 = vmatprep.subr.bf16.mxu0 %v1271_v5  ;;  %976 = vmatprep.subr.bf16.mxu1 %v1271_v5  ;;  %v1299_v10 = vld [vmem:[#allocation2 + $0x20] sm:$0xff]   ;;  %v1306_v12 = vld [vmem:[#allocation2 + $0x28] sm:$0xff]   ;;  %v1313_v14 = vld [vmem:[#allocation2 + $0x30] sm:$0xff]   ;;  %v1351_v23 = vand.u32 127, %v50_v20  ;;  %v1212_v26 = vmov 1.0|1.0  }
  0x17   :  { %957 = vmatpush3.bf16.msra.mxu0 %v1271_v5  ;;  %977 = vmatpush3.bf16.msra.mxu1 %v1271_v5  ;;  %v1322_v15 = vld [vmem:[#allocation2 + $0x38] sm:$0xff]   ;;  %v821_v59 = vld [vmem:[%s1536_s2] ss:$0 sm:$0xff]  ;;  %v826_v60 = vld [vmem:[%s1536_s2 + $0x1] ss:$0 sm:$0xff]  ;;  %s1213_s21 = smov [#allocation5]  }
  0x18   :  { %958 = vmatprep.subr.bf16.mxu0 %v1273_v6  ;;  %978 = vmatprep.subr.bf16.mxu1 %v1273_v6  ;;  %s797_s24 = sshll.u32 %s1213_s21, 4  ;;  %s798_s24 = int_to_ptr.vmem [resolvable:$true] %s797_s24 }
  0x19   :  { %62 = vperm.xlu1 %1130, %v1262_v3   ;;  %56 = vperm.xlu0 %1129, %v1269_v4   ;;  %p1180_p9 = scmp.lt.s32.totalorder %s798_s24, %s798_s24 }
  0x1b   :  { %959 = vmatpush3.bf16.msra.mxu0 %v1273_v6  ;;  %979 = vmatpush3.bf16.msra.mxu1 %v1273_v6 }
  0x1c   :  { %960 = vmatprep.subr.bf16.mxu0 %v1283_v7  ;;  %980 = vmatprep.subr.bf16.mxu1 %v1283_v7 }
  0x1d   :  { %1132 = vset.pattern.permute.xlu1 %v1205_v8  ;;  %1131 = vset.pattern.permute.xlu0 %v1205_v8 }
  0x1e   :  { %188 = vperm.xlu1 %1132, %v1269_v4   ;;  %185 = vperm.xlu0 %1131, %v1257_v2  }
  0x1f   :  { %961 = vmatpush3.bf16.msra.mxu0 %v1283_v7  ;;  %981 = vmatpush3.bf16.msra.mxu1 %v1283_v7 }
  0x20   :  { %962 = vmatprep.subr.bf16.mxu0 %v1290_v9  ;;  %982 = vmatprep.subr.bf16.mxu1 %v1290_v9 }
  0x22   :  { %191 = vperm.xlu1 %1132, %v1252_v1   ;;  %194 = vperm.xlu0 %1131, %v1262_v3  }
  0x23   :  { %963 = vmatpush3.bf16.msra.mxu0 %v1290_v9  ;;  %983 = vmatpush3.bf16.msra.mxu1 %v1290_v9 }
  0x24   :  { %964 = vmatprep.subr.bf16.mxu0 %v1299_v10  ;;  %984 = vmatprep.subr.bf16.mxu1 %v1299_v10 }
  0x26   :  { %1133 = vset.pattern.permute.xlu1 %v1206_v11  ;;  %1134 = vset.pattern.permute.xlu0 %v1206_v11 }
  0x27   :  { %269 = vperm.xlu1 %1133, %v1257_v2   ;;  %272 = vperm.xlu0 %1134, %v1269_v4  }
  0x28   :  { %965 = vmatpush3.bf16.msra.mxu0 %v1299_v10  ;;  %985 = vmatpush3.bf16.msra.mxu1 %v1299_v10 }
  0x29   :  { %966 = vmatprep.subr.bf16.mxu0 %v1306_v12  ;;  %986 = vmatprep.subr.bf16.mxu1 %v1306_v12 }
  0x2b   :  { %275 = vperm.xlu1 %1133, %v1252_v1   ;;  %1135 = vset.pattern.permute.xlu0 %v1207_v13 }
  0x2c   :  { %353 = vperm.xlu0 %1135, %v1257_v2   ;;  %967 = vmatpush3.bf16.msra.mxu0 %v1306_v12 }
  0x2d   :  { %968 = vmatprep.subr.bf16.mxu0 %v1313_v14  ;;  %987 = vmatpush3.bf16.msra.mxu1 %v1306_v12 }
  0x2e   :  { %988 = vmatprep.subr.bf16.mxu1 %v1313_v14 }
  0x2f   :  { %278 = vperm.xlu1 %1133, %v1262_v3  }
  0x30   :  { %362 = vperm.xlu0 %1135, %v1262_v3   ;;  %969 = vmatpush3.bf16.msra.mxu0 %v1313_v14 }
  0x31   :  { %970 = vmatprep.subr.bf16.mxu0 %v1322_v15  ;;  %989 = vmatpush3.bf16.msra.mxu1 %v1313_v14 }
  0x32   :  { %990 = vmatprep.subr.bf16.mxu1 %v1322_v15 }
  0x33   :  { %1136 = vset.pattern.permute.xlu1 %v1207_v13  ;;  %v831_v13 = vld [vmem:[%s1536_s2 + $0x2] ss:$0 sm:$0xff] }
  0x34   :  { %356 = vperm.xlu1 %1136, %v1269_v4   ;;  %1138 = vset.pattern.permute.xlu0 %v1208_v16 }
  0x35   :  { %440 = vperm.xlu0 %1138, %v1269_v4   ;;  %971 = vmatpush3.bf16.msra.mxu0 %v1322_v15 }
  0x36   :  { %996 = vmatprep.subr.bf16.mxu0 %v1271_v5  ;;  %991 = vmatpush3.bf16.msra.mxu1 %v1322_v15 }
  0x37   :  { %1016 = vmatprep.subr.bf16.mxu1 %v1271_v5 }
  0x38   :  { %359 = vperm.xlu1 %1136, %v1252_v1  }
  0x39   :  { %1139 = vset.pattern.permute.xlu0 %v1209_v17 }
  0x3a   :  { %521 = vperm.xlu0 %1139, %v1257_v2  }
  0x3c   :  { %1137 = vset.pattern.permute.xlu1 %v1208_v16 }
  0x3d   :  { %437 = vperm.xlu1 %1137, %v1257_v2  }
  0x3e   :  { %530 = vperm.xlu0 %1139, %v1262_v3  }
  0x41   :  { %443 = vperm.xlu1 %1137, %v1252_v1  }
  0x42   :  { %1142 = vset.pattern.permute.xlu0 %v1210_v18 }
  0x43   :  { %608 = vperm.xlu0 %1142, %v1269_v4  }
  0x45   :  { %446 = vperm.xlu1 %1137, %v1262_v3  }
  0x47   :  { %1143 = vset.pattern.permute.xlu0 %v1211_v19 }
  0x48   :  { %689 = vperm.xlu0 %1143, %v1257_v2  }
  0x49   :  { %1140 = vset.pattern.permute.xlu1 %v1209_v17 }
  0x4a   :  { %524 = vperm.xlu1 %1140, %v1269_v4  }
  0x4c   :  { %698 = vperm.xlu0 %1143, %v1262_v3  }
  0x4e   :  { %527 = vperm.xlu1 %1140, %v1252_v1  }
  0x52   :  { %1141 = vset.pattern.permute.xlu1 %v1210_v18 }
  0x53   :  { %605 = vperm.xlu1 %1141, %v1257_v2  }
  0x57   :  { %611 = vperm.xlu1 %1141, %v1252_v1  }
  0x5b   :  { %614 = vperm.xlu1 %1141, %v1262_v3  }
  0x5f   :  { %1144 = vset.pattern.permute.xlu1 %v1211_v19 }
  0x60   :  { %692 = vperm.xlu1 %1144, %v1269_v4  }
  0x64   :  { %695 = vperm.xlu1 %1144, %v1252_v1  }
  0x94   :  { %v60_v21 = vpop.permute.xlu1 %59  ;;  %v54_v22 = vpop.permute.xlu0 %53 }
  0x95   :  { %vm66_vm0 = vcmp.eq.s32.totalorder %v60_v21, %v1351_v23  ;;  %vm64_vm3 = vcmp.eq.s32.totalorder %v54_v22, %v1351_v23 }
  0x98   :  { %v63_v24 = vpop.permute.xlu1 %62  ;;  %v57_v25 = vpop.permute.xlu0 %56 }
  0x99   :  { %vm67_vm1 = vcmp.eq.s32.totalorder %v63_v24, %v1351_v23  ;;  %vm65_vm2 = vcmp.eq.s32.totalorder %v57_v25, %v1351_v23  ;;  %v836_v25 = vld [vmem:[%s1536_s2 + $0x3] ss:$0 sm:$0xff] }
  0x9a   :  { %vm819_vm4 = vmpackc.low %vm67_vm1, %vm66_vm0 }
  0x9b   :  { %vm817_vm5 = vmpackc.low %vm65_vm2, %vm64_vm3 }
  0x9c   :  { %972 = vmatprep.mubr.msk.bf16.mxu0 %vm817_vm5, %v1212_v26 }
  0x9d   :  { %973 = vmatmul.mubr.msk.bf16.vlgmr.msra.gmra.mrb[0].mxu0 %vm819_vm4, %v1212_v26  ;;  %v189_v27 = vpop.permute.xlu1 %188  ;;  %v186_v28 = vpop.permute.xlu0 %185 }
  0x9e   :  { %997 = vmatpush3.bf16.msra.mxu0 %v1271_v5  ;;  %vm197_vm6 = vcmp.eq.s32.totalorder %v189_v27, %v1351_v23  ;;  %vm196_vm7 = vcmp.eq.s32.totalorder %v186_v28, %v1351_v23 }
  0x9f   :  { %998 = vmatprep.subr.bf16.mxu0 %v1273_v6  ;;  %vm822_vm8 = vmpackc.low %vm197_vm6, %vm196_vm7 }
  0xa0   :  { %992 = vmatprep.mubr.msk.bf16.mxu1 %vm822_vm8, %v1212_v26 }
  0xa1   :  { %v192_v29 = vpop.permute.xlu1 %191  ;;  %v195_v30 = vpop.permute.xlu0 %194 }
  0xa2   :  { %999 = vmatpush3.bf16.msra.mxu0 %v1273_v6  ;;  %vm198_vm9 = vcmp.eq.s32.totalorder %v192_v29, %v1351_v23  ;;  %vm199_vm10 = vcmp.eq.s32.totalorder %v195_v30, %v1351_v23 }
  0xa3   :  { %vm824_vm11 = vmpackc.low %vm199_vm10, %vm198_vm9  ;;  %1000 = vmatprep.subr.bf16.mxu0 %v1283_v7 }
  0xa4   :  { %993 = vmatmul.mubr.msk.bf16.vlgmr.msra.gmra.mrb[0].mxu1 %vm824_vm11, %v1212_v26 }
  0xa5   :  { %1017 = vmatpush3.bf16.msra.mxu1 %v1271_v5 }
  0xa6   :  { %1001 = vmatpush3.bf16.msra.mxu0 %v1283_v7  ;;  %1018 = vmatprep.subr.bf16.mxu1 %v1273_v6  ;;  %v270_v31 = vpop.permute.xlu1 %269  ;;  %v273_v32 = vpop.permute.xlu0 %272 }
  0xa7   :  { %1002 = vmatprep.subr.bf16.mxu0 %v1290_v9  ;;  %vm280_vm12 = vcmp.eq.s32.totalorder %v270_v31, %v1351_v23  ;;  %vm281_vm13 = vcmp.eq.s32.totalorder %v273_v32, %v1351_v23 }
  0xa8   :  { %vm827_vm14 = vmpackc.low %vm281_vm13, %vm280_vm12 }
  0xa9   :  { %1019 = vmatpush3.bf16.msra.mxu1 %v1273_v6  ;;  %1012 = vmatprep.mubr.msk.bf16.mxu0 %vm827_vm14, %v1212_v26 }
  0xaa   :  { %1003 = vmatpush3.bf16.msra.mxu0 %v1290_v9  ;;  %1020 = vmatprep.subr.bf16.mxu1 %v1283_v7  ;;  %v276_v33 = vpop.permute.xlu1 %275 }
  0xab   :  { %1004 = vmatprep.subr.bf16.mxu0 %v1299_v10  ;;  %v354_v34 = vpop.permute.xlu0 %353  ;;  %vm282_vm2 = vcmp.eq.s32.totalorder %v276_v33, %v1351_v23 }
  0xac   :  { %vm364_vm15 = vcmp.eq.s32.totalorder %v354_v34, %v1351_v23 }
  0xad   :  { %1021 = vmatpush3.bf16.msra.mxu1 %v1283_v7 }
  0xae   :  { %1005 = vmatpush3.bf16.msra.mxu0 %v1299_v10  ;;  %1022 = vmatprep.subr.bf16.mxu1 %v1290_v9  ;;  %v279_v35 = vpop.permute.xlu1 %278 }
  0xaf   :  { %1006 = vmatprep.subr.bf16.mxu0 %v1306_v12  ;;  %v363_v37 = vpop.permute.xlu0 %362  ;;  %vm283_vm3 = vcmp.eq.s32.totalorder %v279_v35, %v1351_v23 }
  0xb0   :  { %vm829_vm5 = vmpackc.low %vm283_vm3, %vm282_vm2  ;;  %vm367_vm9 = vcmp.eq.s32.totalorder %v363_v37, %v1351_v23 }
  0xb1   :  { %1023 = vmatpush3.bf16.msra.mxu1 %v1290_v9 }
  0xb2   :  { %1007 = vmatpush3.bf16.msra.mxu0 %v1306_v12  ;;  %1024 = vmatprep.subr.bf16.mxu1 %v1299_v10 }
  0xb3   :  { %1008 = vmatprep.subr.bf16.mxu0 %v1313_v14  ;;  %v357_v36 = vpop.permute.xlu1 %356 }
  0xb4   :  { %vm365_vm0 = vcmp.eq.s32.totalorder %v357_v36, %v1351_v23  ;;  %v441_v39 = vpop.permute.xlu0 %440 }
  0xb5   :  { %1025 = vmatpush3.bf16.msra.mxu1 %v1299_v10  ;;  %vm832_vm1 = vmpackc.low %vm365_vm0, %vm364_vm15  ;;  %vm449_vm4 = vcmp.eq.s32.totalorder %v441_v39, %v1351_v23  ;;  %v841_v39 = vld [vmem:[%s1536_s2 + $0x4] ss:$0 sm:$0xff] }
  0xb6   :  { %1009 = vmatpush3.bf16.msra.mxu0 %v1313_v14  ;;  %1026 = vmatprep.subr.bf16.mxu1 %v1306_v12 }
  0xb7   :  { %1010 = vmatprep.subr.bf16.mxu0 %v1322_v15  ;;  %1032 = vmatprep.mubr.msk.bf16.mxu1 %vm832_vm1, %v1212_v26  ;;  %v360_v38 = vpop.permute.xlu1 %359 }
  0xb8   :  { %vm366_vm8 = vcmp.eq.s32.totalorder %v360_v38, %v1351_v23 }
  0xb9   :  { %1027 = vmatpush3.bf16.msra.mxu1 %v1306_v12  ;;  %vm834_vm10 = vmpackc.low %vm367_vm9, %vm366_vm8  ;;  %v522_v43 = vpop.permute.xlu0 %521 }
  0xba   :  { %1011 = vmatpush3.bf16.msra.mxu0 %v1322_v15  ;;  %1028 = vmatprep.subr.bf16.mxu1 %v1313_v14  ;;  %vm532_vm11 = vcmp.eq.s32.totalorder %v522_v43, %v1351_v23 }
  0xbb   :  { %1036 = vmatprep.subr.bf16.mxu0 %v1271_v5 }
  0xbc   :  { %v438_v40 = vpop.permute.xlu1 %437 }
  0xbd   :  { %1013 = vmatmul.mubr.msk.bf16.vlgmr.msra.gmra.mrb[4].mxu0 %vm829_vm5, %v1212_v26  ;;  %1029 = vmatpush3.bf16.msra.mxu1 %v1313_v14  ;;  %vm448_vm6 = vcmp.eq.s32.totalorder %v438_v40, %v1351_v23  ;;  %v531_v46 = vpop.permute.xlu0 %530 }
  0xbe   :  { %1037 = vmatpush3.bf16.msra.mxu0 %v1271_v5  ;;  %1030 = vmatprep.subr.bf16.mxu1 %v1322_v15  ;;  %vm837_vm7 = vmpackc.low %vm449_vm4, %vm448_vm6  ;;  %vm535_vm6 = vcmp.eq.s32.totalorder %v531_v46, %v1351_v23 }
  0xbf   :  { %1038 = vmatprep.subr.bf16.mxu0 %v1273_v6  ;;  %1052 = vmatprep.mubr.msk.bf16.mxu0 %vm837_vm7, %v1212_v26 }
  0xc0   :  { %v444_v41 = vpop.permute.xlu1 %443 }
  0xc1   :  { %1031 = vmatpush3.bf16.msra.mxu1 %v1322_v15  ;;  %vm450_vm14 = vcmp.eq.s32.totalorder %v444_v41, %v1351_v23 }
  0xc2   :  { %1039 = vmatpush3.bf16.msra.mxu0 %v1273_v6  ;;  %1056 = vmatprep.subr.bf16.mxu1 %v1271_v5  ;;  %v609_v49 = vpop.permute.xlu0 %608 }
  0xc3   :  { %1040 = vmatprep.subr.bf16.mxu0 %v1283_v7  ;;  %vm617_vm1 = vcmp.eq.s32.totalorder %v609_v49, %v1351_v23 }
  0xc4   :  { %1033 = vmatmul.mubr.msk.bf16.vlgmr.msra.gmra.mrb[4].mxu1 %vm834_vm10, %v1212_v26  ;;  %v447_v42 = vpop.permute.xlu1 %446 }
  0xc5   :  { %1057 = vmatpush3.bf16.msra.mxu1 %v1271_v5  ;;  %vm451_vm15 = vcmp.eq.s32.totalorder %v447_v42, %v1351_v23 }
  0xc6   :  { %1041 = vmatpush3.bf16.msra.mxu0 %v1283_v7  ;;  %1058 = vmatprep.subr.bf16.mxu1 %v1273_v6  ;;  %vm839_vm2 = vmpackc.low %vm451_vm15, %vm450_vm14 }
  0xc7   :  { %1042 = vmatprep.subr.bf16.mxu0 %v1290_v9  ;;  %v690_v51 = vpop.permute.xlu0 %689 }
  0xc8   :  { %vm700_vm4 = vcmp.eq.s32.totalorder %v690_v51, %v1351_v23  ;;  %v846_v51 = vld [vmem:[%s1536_s2 + $0x5] ss:$0 sm:$0xff] }
  0xc9   :  { %1059 = vmatpush3.bf16.msra.mxu1 %v1273_v6  ;;  %v525_v44 = vpop.permute.xlu1 %524 }
  0xca   :  { %1043 = vmatpush3.bf16.msra.mxu0 %v1290_v9  ;;  %1060 = vmatprep.subr.bf16.mxu1 %v1283_v7  ;;  %vm533_vm12 = vcmp.eq.s32.totalorder %v525_v44, %v1351_v23 }
  0xcb   :  { %1044 = vmatprep.subr.bf16.mxu0 %v1299_v10  ;;  %vm842_vm13 = vmpackc.low %vm533_vm12, %vm532_vm11  ;;  %v699_v54 = vpop.permute.xlu0 %698 }
  0xcc   :  { %1072 = vmatprep.mubr.msk.bf16.mxu1 %vm842_vm13, %v1212_v26  ;;  %vm703_vm14 = vcmp.eq.s32.totalorder %v699_v54, %v1351_v23 }
  0xcd   :  { %1061 = vmatpush3.bf16.msra.mxu1 %v1283_v7  ;;  %v528_v45 = vpop.permute.xlu1 %527 }
  0xce   :  { %1045 = vmatpush3.bf16.msra.mxu0 %v1299_v10  ;;  %1062 = vmatprep.subr.bf16.mxu1 %v1290_v9  ;;  %vm534_vm5 = vcmp.eq.s32.totalorder %v528_v45, %v1351_v23 }
  0xcf   :  { %1046 = vmatprep.subr.bf16.mxu0 %v1306_v12  ;;  %vm844_vm9 = vmpackc.low %vm535_vm6, %vm534_vm5 }
  0xd1   :  { %1063 = vmatpush3.bf16.msra.mxu1 %v1290_v9 }
  0xd2   :  { %1047 = vmatpush3.bf16.msra.mxu0 %v1306_v12  ;;  %1064 = vmatprep.subr.bf16.mxu1 %v1299_v10  ;;  %v606_v47 = vpop.permute.xlu1 %605 }
  0xd3   :  { %1048 = vmatprep.subr.bf16.mxu0 %v1313_v14  ;;  %vm616_vm0 = vcmp.eq.s32.totalorder %v606_v47, %v1351_v23 }
  0xd4   :  { %vm847_vm3 = vmpackc.low %vm617_vm1, %vm616_vm0 }
  0xd5   :  { %1065 = vmatpush3.bf16.msra.mxu1 %v1299_v10 }
  0xd6   :  { %1049 = vmatpush3.bf16.msra.mxu0 %v1313_v14  ;;  %1066 = vmatprep.subr.bf16.mxu1 %v1306_v12  ;;  %v612_v48 = vpop.permute.xlu1 %611 }
  0xd7   :  { %1050 = vmatprep.subr.bf16.mxu0 %v1322_v15  ;;  %vm618_vm10 = vcmp.eq.s32.totalorder %v612_v48, %v1351_v23 }
  0xd9   :  { %1067 = vmatpush3.bf16.msra.mxu1 %v1306_v12 }
  0xda   :  { %1051 = vmatpush3.bf16.msra.mxu0 %v1322_v15  ;;  %1068 = vmatprep.subr.bf16.mxu1 %v1313_v14  ;;  %v615_v50 = vpop.permute.xlu1 %614 }
  0xdb   :  { %1076 = vmatprep.subr.bf16.mxu0 %v1271_v5  ;;  %vm619_vm11 = vcmp.eq.s32.totalorder %v615_v50, %v1351_v23 }
  0xdc   :  { %vm849_vm12 = vmpackc.low %vm619_vm11, %vm618_vm10 }
  0xdd   :  { %1053 = vmatmul.mubr.msk.bf16.vlgmr.msra.gmra.mrb[8].mxu0 %vm839_vm2, %v1212_v26  ;;  %1069 = vmatpush3.bf16.msra.mxu1 %v1313_v14 }
  0xde   :  { %1077 = vmatpush3.bf16.msra.mxu0 %v1271_v5  ;;  %1070 = vmatprep.subr.bf16.mxu1 %v1322_v15 }
  0xdf   :  { %1078 = vmatprep.subr.bf16.mxu0 %v1273_v6  ;;  %1092 = vmatprep.mubr.msk.bf16.mxu0 %vm847_vm3, %v1212_v26  ;;  %v693_v52 = vpop.permute.xlu1 %692 }
  0xe0   :  { %vm701_vm7 = vcmp.eq.s32.totalorder %v693_v52, %v1351_v23 }
  0xe1   :  { %1071 = vmatpush3.bf16.msra.mxu1 %v1322_v15  ;;  %vm852_vm8 = vmpackc.low %vm701_vm7, %vm700_vm4 }
  0xe2   :  { %1079 = vmatpush3.bf16.msra.mxu0 %v1273_v6  ;;  %1096 = vmatprep.subr.bf16.mxu1 %v1271_v5 }
  0xe3   :  { %1080 = vmatprep.subr.bf16.mxu0 %v1283_v7  ;;  %v696_v53 = vpop.permute.xlu1 %695 }
  0xe4   :  { %1073 = vmatmul.mubr.msk.bf16.vlgmr.msra.gmra.mrb[8].mxu1 %vm844_vm9, %v1212_v26  ;;  %vm702_vm13 = vcmp.eq.s32.totalorder %v696_v53, %v1351_v23 }
  0xe5   :  { %1097 = vmatpush3.bf16.msra.mxu1 %v1271_v5  ;;  %1112 = vmatprep.mubr.msk.bf16.mxu1 %vm852_vm8, %v1212_v26  ;;  %vm854_vm15 = vmpackc.low %vm703_vm14, %vm702_vm13 }
  0xe6   :  { %1081 = vmatpush3.bf16.msra.mxu0 %v1283_v7  ;;  %1098 = vmatprep.subr.bf16.mxu1 %v1273_v6 }
  0xe7   :  { %1082 = vmatprep.subr.bf16.mxu0 %v1290_v9 }
  0xe9   :  { %1099 = vmatpush3.bf16.msra.mxu1 %v1273_v6 }
  0xea   :  { %1083 = vmatpush3.bf16.msra.mxu0 %v1290_v9  ;;  %1100 = vmatprep.subr.bf16.mxu1 %v1283_v7 }
  0xeb   :  { %1084 = vmatprep.subr.bf16.mxu0 %v1299_v10 }
  0xed   :  { %1101 = vmatpush3.bf16.msra.mxu1 %v1283_v7 }
  0xee   :  { %1085 = vmatpush3.bf16.msra.mxu0 %v1299_v10  ;;  %1102 = vmatprep.subr.bf16.mxu1 %v1290_v9 }
  0xef   :  { %1086 = vmatprep.subr.bf16.mxu0 %v1306_v12 }
  0xf1   :  { %1103 = vmatpush3.bf16.msra.mxu1 %v1290_v9 }
  0xf2   :  { %1087 = vmatpush3.bf16.msra.mxu0 %v1306_v12  ;;  %1104 = vmatprep.subr.bf16.mxu1 %v1299_v10 }
  0xf3   :  { %1088 = vmatprep.subr.bf16.mxu0 %v1313_v14 }
  0xf5   :  { %1105 = vmatpush3.bf16.msra.mxu1 %v1299_v10 }
  0xf6   :  { %1089 = vmatpush3.bf16.msra.mxu0 %v1313_v14  ;;  %1106 = vmatprep.subr.bf16.mxu1 %v1306_v12 }
  0xf7   :  { %1090 = vmatprep.subr.bf16.mxu0 %v1322_v15 }
  0xf9   :  { %1107 = vmatpush3.bf16.msra.mxu1 %v1306_v12 }
  0xfa   :  { %1091 = vmatpush3.bf16.msra.mxu0 %v1322_v15  ;;  %1108 = vmatprep.subr.bf16.mxu1 %v1313_v14 }
  0xfd   :  { %1093 = vmatmul.mubr.msk.bf16.vlgmr.msra.gmra.mrb[12].mxu0 %vm849_vm12, %v1212_v26  ;;  %1109 = vmatpush3.bf16.msra.mxu1 %v1313_v14 }
  0xfe   :  { %1110 = vmatprep.subr.bf16.mxu1 %v1322_v15 }
 0x101   :  { %1111 = vmatpush3.bf16.msra.mxu1 %v1322_v15 }
 0x104   :  { %1113 = vmatmul.mubr.msk.bf16.vlgmr.msra.gmra.mrb[12].mxu1 %vm854_vm15, %v1212_v26 }
 0x170   :  { %v974_v55 = vpop.f32.mrb[0].mxu0 }
 0x171   :  { %v156_v56 = vpop.f32.mrb[1].mxu0  ;;  %v178_v62 = vmul.f32 %v974_v55, %v821_v59 }
 0x172   :  { %v975_v57 = vpop.f32.mrb[2].mxu0  ;;  %v176_v1 = vmul.f32 %v821_v59, %v156_v56 }
 0x173   :  { %v159_v58 = vpop.f32.mrb[3].mxu0  ;;  %v179_v4 = vmul.f32 %v975_v57, %v821_v59 }
 0x174   :  { %v177_v8 = vmul.f32 %v821_v59, %v159_v58 }
 0x177   :  { %v994_v61 = vpop.f32.mrb[0].mxu1 }
 0x178   :  { %v262_v63 = vmul.f32 %v994_v61, %v826_v60  ;;  %v240_v0 = vpop.f32.mrb[1].mxu1 }
 0x179   :  { %v260_v2 = vmul.f32 %v826_v60, %v240_v0  ;;  %v995_v3 = vpop.f32.mrb[2].mxu1 }
 0x17a   :  { %v266_v5 = vadd.f32 %v262_v63, %v178_v62  ;;  %v263_v6 = vmul.f32 %v995_v3, %v826_v60  ;;  %v243_v7 = vpop.f32.mrb[3].mxu1 }
 0x17b   :  { %v264_v9 = vadd.f32 %v260_v2, %v176_v1  ;;  %v261_v10 = vmul.f32 %v826_v60, %v243_v7  ;;  %v851_v1 = vld [vmem:[%s1536_s2 + $0x6] ss:$0 sm:$0xff] }
 0x17c   :  { %v267_v11 = vadd.f32 %v263_v6, %v179_v4 }
 0x17d   :  { %v265_v12 = vadd.f32 %v261_v10, %v177_v8 }
 0x190   :  { %v1014_v14 = vpop.f32.mrb[4].mxu0 }
 0x191   :  { %v346_v15 = vmul.f32 %v1014_v14, %v831_v13  ;;  %v324_v16 = vpop.f32.mrb[5].mxu0 }
 0x192   :  { %v344_v17 = vmul.f32 %v831_v13, %v324_v16  ;;  %v1015_v18 = vpop.f32.mrb[6].mxu0 }
 0x193   :  { %v350_v19 = vadd.f32 %v346_v15, %v266_v5  ;;  %v347_v20 = vmul.f32 %v1015_v18, %v831_v13  ;;  %v327_v21 = vpop.f32.mrb[7].mxu0 }
 0x194   :  { %v348_v22 = vadd.f32 %v344_v17, %v264_v9  ;;  %v345_v23 = vmul.f32 %v831_v13, %v327_v21  ;;  %v856_v13 = vld [vmem:[%s1536_s2 + $0x7] ss:$0 sm:$0xff]  ;;  %s1175_s2 = scalar_lea.vmem %s798_s24, 256 }
 0x195   :  { %v351_v24 = vadd.f32 %v347_v20, %v267_v11  ;;  %p1176_p8 = scmp.ne.s32.totalorder %s798_s24, %s1175_s2  ;;  %p1181_p10 = scmp.lt.s32.totalorder %s1175_s2, %s1175_s2 }
 0x196   :  { %v349_v26 = vadd.f32 %v345_v23, %v265_v12 }
 0x197   :  { %v1034_v27 = vpop.f32.mrb[4].mxu1  ;;  %p1182_p11 = por %p1181_p10, %p1180_p9 }
 0x198   :  { %v430_v28 = vmul.f32 %v1034_v27, %v836_v25  ;;  %v408_v29 = vpop.f32.mrb[5].mxu1 }
 0x199   :  { %v428_v30 = vmul.f32 %v836_v25, %v408_v29  ;;  %v1035_v31 = vpop.f32.mrb[6].mxu1  ;;  %p1183_p12 = pnand %p1182_p11, %p1176_p8 }
 0x19a   :  { %v434_v32 = vadd.f32 %v430_v28, %v350_v19  ;;  %v431_v33 = vmul.f32 %v1035_v31, %v836_v25  ;;  %v411_v34 = vpop.f32.mrb[7].mxu1 }
 0x19b   :  { %v432_v35 = vadd.f32 %v428_v30, %v348_v22  ;;  %v429_v36 = vmul.f32 %v836_v25, %v411_v34 }
 0x19c   :  { %v435_v37 = vadd.f32 %v431_v33, %v351_v24 }
 0x19d   :  { %v433_v38 = vadd.f32 %v429_v36, %v349_v26 }
 0x1b0   :  { %v1054_v40 = vpop.f32.mrb[8].mxu0 }
 0x1b1   :  { %v514_v41 = vmul.f32 %v1054_v40, %v841_v39  ;;  %v492_v42 = vpop.f32.mrb[9].mxu0 }
 0x1b2   :  { %v512_v43 = vmul.f32 %v841_v39, %v492_v42  ;;  %v1055_v44 = vpop.f32.mrb[10].mxu0 }
 0x1b3   :  { %v518_v45 = vadd.f32 %v514_v41, %v434_v32  ;;  %v515_v46 = vmul.f32 %v1055_v44, %v841_v39  ;;  %v495_v47 = vpop.f32.mrb[11].mxu0 }
 0x1b4   :  { %v516_v48 = vadd.f32 %v512_v43, %v432_v35  ;;  %v513_v49 = vmul.f32 %v841_v39, %v495_v47 }
 0x1b5   :  { %v519_v50 = vadd.f32 %v515_v46, %v435_v37 }
 0x1b6   :  { %v517_v52 = vadd.f32 %v513_v49, %v433_v38 }
 0x1b7   :  { %v1074_v53 = vpop.f32.mrb[8].mxu1 }
 0x1b8   :  { %v598_v54 = vmul.f32 %v1074_v53, %v846_v51  ;;  %v576_v55 = vpop.f32.mrb[9].mxu1 }
 0x1b9   :  { %v596_v56 = vmul.f32 %v846_v51, %v576_v55  ;;  %v1075_v57 = vpop.f32.mrb[10].mxu1 }
 0x1ba   :  { %v602_v58 = vadd.f32 %v598_v54, %v518_v45  ;;  %v599_v59 = vmul.f32 %v1075_v57, %v846_v51  ;;  %v579_v60 = vpop.f32.mrb[11].mxu1 }
 0x1bb   :  { %v600_v61 = vadd.f32 %v596_v56, %v516_v48  ;;  %v597_v62 = vmul.f32 %v846_v51, %v579_v60 }
 0x1bc   :  { %v603_v63 = vadd.f32 %v599_v59, %v519_v50 }
 0x1bd   :  { %v601_v0 = vadd.f32 %v597_v62, %v517_v52 }
 0x1d0   :  { %v1094_v2 = vpop.f32.mrb[12].mxu0 }
 0x1d1   :  { %v682_v3 = vmul.f32 %v1094_v2, %v851_v1  ;;  %v660_v4 = vpop.f32.mrb[13].mxu0 }
 0x1d2   :  { %v680_v5 = vmul.f32 %v851_v1, %v660_v4  ;;  %v1095_v6 = vpop.f32.mrb[14].mxu0 }
 0x1d3   :  { %v686_v7 = vadd.f32 %v682_v3, %v602_v58  ;;  %v683_v8 = vmul.f32 %v1095_v6, %v851_v1  ;;  %v663_v9 = vpop.f32.mrb[15].mxu0 }
 0x1d4   :  { %v684_v10 = vadd.f32 %v680_v5, %v600_v61  ;;  %v681_v11 = vmul.f32 %v851_v1, %v663_v9 }
 0x1d5   :  { %v687_v12 = vadd.f32 %v683_v8, %v603_v63 }
 0x1d6   :  { %v685_v14 = vadd.f32 %v681_v11, %v601_v0 }
 0x1d7   :  { %v1114_v15 = vpop.f32.mrb[12].mxu1 }
 0x1d8   :  { %v766_v16 = vmul.f32 %v1114_v15, %v856_v13  ;;  %v744_v17 = vpop.f32.mrb[13].mxu1 }
 0x1d9   :  { %v764_v18 = vmul.f32 %v856_v13, %v744_v17  ;;  %v1115_v19 = vpop.f32.mrb[14].mxu1 }
 0x1da   :  { %v770_v20 = vadd.f32 %v766_v16, %v686_v7  ;;  %v767_v21 = vmul.f32 %v1115_v19, %v856_v13  ;;  %v747_v22 = vpop.f32.mrb[15].mxu1 }
 0x1db   :  { %v768_v23 = vadd.f32 %v764_v18, %v684_v10  ;;  %v765_v24 = vmul.f32 %v856_v13, %v747_v22 }
 0x1dc   :  { %v771_v25 = vadd.f32 %v767_v21, %v687_v12 }
 0x1dd   :  { %v769_v26 = vadd.f32 %v765_v24, %v685_v14 }
 0x1de   :  { %v873_v27 = vpack.c.bf16 %v771_v25, %v770_v20 }
 0x1df   :  { %v868_v28 = vpack.c.bf16 %v769_v26, %v768_v23 }
 0x1e0   :  { %875 = vst [vmem:[#allocation5 + $0x8] sm:$0xff] %v873_v27  }
 0x1e1   :  { %869 = vst [vmem:[#allocation5] sm:$0xff] %v868_v28  }
 0x1e2   :  { %1186 = shalt.err (!%p1183_p12)
}
 0x1e3   :  { %s1187_s27 = scalar_lea.hbm %s1537_s3, 256 }
 0x1e4   :  { %p1188_p13 = scmp.ne.s32.totalorder %s1537_s3, %s1187_s27  ;;  %p1191_p0 = scmp.lt.u32.totalorder %s1187_s27, %s1537_s3 }
 0x1e6   :  { %p1193_p1 = pnand %p1191_p0, %p1188_p13 }
 0x1e8   :  { %1196 = shalt.err (!%p1193_p1)
}
 0x1e9   :  { %803 = dma.vmem_to_hbm [thread:$0]  %s798_s24, 256, %s1537_s3, [#allocation4], %s1202_s22, %s1202_s22, %s1203_s23  }
 0x1ea   :  { %1199 = dma.done.wait [#allocation4], 256  }
 0x1eb   :  { %1200 = vsyncadd [#allocation4], 4294967040 }
 0x1ec   :  { %807 = vsyncpa [#allocation3], 1 }
 0x1ed   :  { %808 = vsyncpa [#allocation4], 1 }

</bundles_post_ra>
